<compile_context>
chip_gen: v6e
topology: v6e:2x2x1
jax: 0.10.0
libtpu: 0.0.40
codegen_flags: <defaults>
</compile_context>

<pallas_src>
import jax
import jax.numpy as jnp
from jax import lax
from jax.experimental import pallas as pl
from jax.experimental.pallas import tpu as pltpu

H = 128        # padded hidden width (100 -> 128)
LATENT = 8
IN_DIM = 2
OUT_DIM = 2


# ---------------------------------------------------------------------------
# Kernel
# ---------------------------------------------------------------------------
def _autoencoder_kernel(
    x_ref,
    we1, be1, we2, be2, we3, be3,
    wcat, bcat,
    wd2, bd2, wd3, bd3, wd4, bd4,
    out_ref,
):
    """One batch tile of the full autoencoder forward.

    x_ref  : (TM, 2)    f32
    we1    : (2, 128)   f32   (layer 1 handled on the VPU, K=2)
    we2/we3/wd2/wd3/wd4: (128, 128) bf16
    wcat   : (128, 256) bf16  = [we4_pad || (we4@wd1)_pad]
    biases : (1, 128) / (1, 256) f32
    out_ref: (TM, 128)  bf16  — enc in lanes 0:8, dec in lanes 8:10
    """
    x = x_ref[...]                      # (TM, 2)  f32
    w1 = we1[...]                       # (2, 128) f32

    # ---- Encoder layer 1 (2 -> 128): K=2 outer product on the VPU ----
    h = x[:, 0:1] * w1[0:1, :] + x[:, 1:2] * w1[1:2, :] + be1[...]
    h = jnp.maximum(h, 0.0).astype(jnp.bfloat16)    # ReLU in f32, carry bf16

    def dense_relu(a_bf16, w_ref, b_ref):
        y = jnp.dot(a_bf16, w_ref[...],
                    preferred_element_type=jnp.float32) + b_ref[...]
        return jnp.maximum(y, 0.0).astype(jnp.bfloat16)

    # ---- Encoder layers 2..3 ----
    h = dense_relu(h, we2, be2)
    h3 = dense_relu(h, we3, be3)                    # (TM, 128) bf16

    # ---- Encoder output + fused decoder-input layer in ONE (128,256) matmul ----
    y = jnp.dot(h3, wcat[...],
                preferred_element_type=jnp.float32) + bcat[...]   # (TM, 256)
    enc = y[:, :H]                                   # lanes 0:8 valid, rest 0
    g = jnp.maximum(y[:, H:], 0.0).astype(jnp.bfloat16)  # relu(h3@(We4@Wd1)+...)

    # ---- Remaining decoder layers ----
    g = dense_relu(g, wd2, bd2)
    g = dense_relu(g, wd3, bd3)
    # wd4/bd4 were pre-shifted so decoder output lands in lanes 8:10.
    dec = jnp.dot(g, wd4[...],
                  preferred_element_type=jnp.float32) + bd4[...]  # (TM, 128)

    # ---- Merge into one lane-dense bf16 slab: enc @ lanes 0:8, dec @ 8:10 ----
    col = lax.broadcasted_iota(jnp.int32, enc.shape, 1)
    out_ref[...] = jnp.where(col < LATENT, enc, dec).astype(out_ref.dtype)


# ---------------------------------------------------------------------------
# Host-side parameter preparation (padding, fusion, concat, bf16 cast)
# ---------------------------------------------------------------------------
def _pad_to(a, shape):
    pads = [(0, t - s) for s, t in zip(a.shape, shape)]
    return jnp.pad(a, pads)


def prepare_kernel_params(params):
    (we1, be1, we2, be2, we3, be3, we4, be4,
     wd1, bd1, wd2, bd2, wd3, bd3, wd4, bd4) = params
    f32, bf16 = jnp.float32, jnp.bfloat16

    # Fuse encoder-output layer into decoder-input layer (both linear, no ReLU
    # in between -> mathematically exact composition). Done in f32 on host.
    wf = we4 @ wd1                  # (100, 100)
    bfu = be4 @ wd1 + bd1           # (1, 100)

    # Concatenate [we4 || wf] along N so enc and the decoder chain input come
    # from a single 256-wide MXU pass.
    wcat = jnp.concatenate([_pad_to(we4, (H, H)), _pad_to(wf, (H, H))], axis=1)
    bcat = jnp.concatenate([_pad_to(be4, (1, H)), _pad_to(bfu, (1, H))], axis=1)

    # Pre-shift decoder output layer to columns LATENT:LATENT+OUT_DIM so the
    # kernel can merge enc/dec into one output slab with a cheap lane select.
    kin = wd4.shape[0]
    wd4_sh = jnp.zeros((H, H), f32).at[:kin, LATENT:LATENT + OUT_DIM].set(wd4)
    bd4_sh = jnp.zeros((1, H), f32).at[:, LATENT:LATENT + OUT_DIM].set(bd4)

    return [
        _pad_to(we1, (IN_DIM, H)).astype(f32), _pad_to(be1, (1, H)).astype(f32),
        _pad_to(we2, (H, H)).astype(bf16),     _pad_to(be2, (1, H)).astype(f32),
        _pad_to(we3, (H, H)).astype(bf16),     _pad_to(be3, (1, H)).astype(f32),
        wcat.astype(bf16),                     bcat.astype(f32),
        _pad_to(wd2, (H, H)).astype(bf16),     _pad_to(bd2, (1, H)).astype(f32),
        _pad_to(wd3, (H, H)).astype(bf16),     _pad_to(bd3, (1, H)).astype(f32),
        wd4_sh.astype(bf16),                   bd4_sh.astype(f32),
    ]


# ---------------------------------------------------------------------------
# Wrapper
# ---------------------------------------------------------------------------
def autoencoder_forward(x, params, *, tile_m=None):
    """x: (B, 2) float32. params: 16 raw (in,out)-layout arrays (8 W/b pairs).

    Returns (encoded (B, 8), decoded (B, 2)) in float32."""
    B = x.shape[0]
    kparams = prepare_kernel_params(params)

    if tile_m is None:
        # Amortize per-grid-step overhead with big tiles, but keep >= 2 tiles
        # whenever possible so v7x's two TensorCores both get work.
        tile_m = max(8, min(512, pl.cdiv(pl.cdiv(B, 2), 8) * 8))
    n_tiles = pl.cdiv(B, tile_m)
    padded_B = n_tiles * tile_m
    x_p = jnp.pad(x, ((0, padded_B - B), (0, 0))) if padded_B != B else x
    # TODO(synk): if an xprof trace shows the (B,2) f32 x fetch is (8,128)-tile
    # padded in HBM (512 B/row), accept a pre-packed / bf16 x from the caller.

    def const_spec(arr):
        shp = arr.shape
        return pl.BlockSpec(shp, lambda i: (0,) * len(shp))

    in_specs = [pl.BlockSpec((tile_m, IN_DIM), lambda i: (i, 0))]
    in_specs += [const_spec(a) for a in kparams]   # weights resident, no re-DMA
    out_specs = pl.BlockSpec((tile_m, H), lambda i: (i, 0))  # single merged slab
    out_shape = jax.ShapeDtypeStruct((padded_B, H), jnp.bfloat16)

    merged = pl.pallas_call(
        _autoencoder_kernel,
        grid=(n_tiles,),
        in_specs=in_specs,
        out_specs=out_specs,
        out_shape=out_shape,
        compiler_params=pltpu.CompilerParams(
            dimension_semantics=("parallel",)),   # batch tiles are independent
    )(x_p, *kparams)

    enc = merged[:B, :LATENT].astype(jnp.float32)
    dec = merged[:B, LATENT:LATENT + OUT_DIM].astype(jnp.float32)
    return enc, dec


# ---------------------------------------------------------------------------
# Init + plain-JAX reference
# ---------------------------------------------------------------------------
def init_params(key):
    """PyTorch nn.Linear-style init U[-1/sqrt(in), 1/sqrt(in)].
    Weights stored (in, out) — transposed vs PyTorch's (out, in)."""
    dims = [
        (2, 100), (100, 100), (100, 100), (100, 8),     # encoder
        (8, 100), (100, 100), (100, 100), (100, 2),     # decoder
    ]
    params = []
    for fan_in, fan_out in dims:
        key, kw, kb = jax.random.split(key, 3)
        bound = 1.0 / jnp.sqrt(float(fan_in))
        params.append(jax.random.uniform(kw, (fan_in, fan_out), jnp.float32,
                                         -bound, bound))
        params.append(jax.random.uniform(kb, (1, fan_out), jnp.float32,
                                         -bound, bound))
    return params


def reference_forward(x, params):
    (we1, be1, we2, be2, we3, be3, we4, be4,
     wd1, bd1, wd2, bd2, wd3, bd3, wd4, bd4) = params
    h = jnp.maximum(x @ we1 + be1, 0.0)
    h = jnp.maximum(h @ we2 + be2, 0.0)
    h = jnp.maximum(h @ we3 + be3, 0.0)
    enc = h @ we4 + be4
    g = jnp.maximum(enc @ wd1 + bd1, 0.0)
    g = jnp.maximum(g @ wd2 + bd2, 0.0)
    g = jnp.maximum(g @ wd3 + bd3, 0.0)
    dec = g @ wd4 + bd4
    return enc, dec


if __name__ == "__main__":
    key = jax.random.PRNGKey(0)
    kx, kp = jax.random.split(key)
    params = init_params(kp)

    # Small-batch check (single grid step).
    B = 8
    x = jax.random.normal(kx, (B, 2), jnp.float32)
    enc, dec = autoencoder_forward(x, params)
    enc, dec = jax.block_until_ready((enc, dec))
    enc_ref, dec_ref = reference_forward(x, params)
    assert enc.shape == (B, LATENT) and dec.shape == (B, OUT_DIM)
    # bf16 matmul operands/activations + bf16 output + We4@Wd1 fusion change
    # rounding -> looser tolerance.
    assert jnp.allclose(enc, enc_ref, atol=5e-2, rtol=5e-2)
    assert jnp.allclose(dec, dec_ref, atol=5e-2, rtol=5e-2)

    # Multi-tile check (exercises the batch grid + padded tail rows).
    B2 = 300
    x2 = jax.random.normal(jax.random.fold_in(kx, 1), (B2, 2), jnp.float32)
    enc2, dec2 = autoencoder_forward(x2, params)
    enc2, dec2 = jax.block_until_ready((enc2, dec2))
    enc2_ref, dec2_ref = reference_forward(x2, params)
    assert enc2.shape == (B2, LATENT) and dec2.shape == (B2, OUT_DIM)
    assert jnp.allclose(enc2, enc2_ref, atol=5e-2, rtol=5e-2)
    assert jnp.allclose(dec2, dec2_ref, atol=5e-2, rtol=5e-2)

    print("KERNEL_OK")
</pallas_src>

<mosaic_0001>
module attributes {stable_mosaic.version = 11 : i64} {
  func.func @_autoencoder_kernel(%arg0: i32, %arg1: memref<8x2xf32, #tpu.memory_space<vmem>>, %arg2: memref<2x128xf32, #tpu.memory_space<vmem>>, %arg3: memref<1x128xf32, #tpu.memory_space<vmem>>, %arg4: memref<128x128xbf16, #tpu.memory_space<vmem>>, %arg5: memref<1x128xf32, #tpu.memory_space<vmem>>, %arg6: memref<128x128xbf16, #tpu.memory_space<vmem>>, %arg7: memref<1x128xf32, #tpu.memory_space<vmem>>, %arg8: memref<128x256xbf16, #tpu.memory_space<vmem>>, %arg9: memref<1x256xf32, #tpu.memory_space<vmem>>, %arg10: memref<128x128xbf16, #tpu.memory_space<vmem>>, %arg11: memref<1x128xf32, #tpu.memory_space<vmem>>, %arg12: memref<128x128xbf16, #tpu.memory_space<vmem>>, %arg13: memref<1x128xf32, #tpu.memory_space<vmem>>, %arg14: memref<128x128xbf16, #tpu.memory_space<vmem>>, %arg15: memref<1x128xf32, #tpu.memory_space<vmem>>, %arg16: memref<8x128xbf16, #tpu.memory_space<vmem>>) attributes {dimension_semantics = [#tpu.dimension_semantics<parallel>], iteration_bounds = array<i64: 1>, scalar_prefetch = 0 : i64, scratch_operands = 0 : i64, tpu.core_type = #tpu.core_type<tc>, window_params = [{transform_indices = @transform_0, window_bounds = array<i64: 8, 2>}, {pipeline_mode = #tpu.pipeline_mode<synchronous>, transform_indices = @transform_1, window_bounds = array<i64: 2, 128>}, {pipeline_mode = #tpu.pipeline_mode<synchronous>, transform_indices = @transform_2, window_bounds = array<i64: 1, 128>}, {pipeline_mode = #tpu.pipeline_mode<synchronous>, transform_indices = @transform_3, window_bounds = array<i64: 128, 128>}, {pipeline_mode = #tpu.pipeline_mode<synchronous>, transform_indices = @transform_4, window_bounds = array<i64: 1, 128>}, {pipeline_mode = #tpu.pipeline_mode<synchronous>, transform_indices = @transform_5, window_bounds = array<i64: 128, 128>}, {pipeline_mode = #tpu.pipeline_mode<synchronous>, transform_indices = @transform_6, window_bounds = array<i64: 1, 128>}, {pipeline_mode = #tpu.pipeline_mode<synchronous>, transform_indices = @transform_7, window_bounds = array<i64: 128, 256>}, {pipeline_mode = #tpu.pipeline_mode<synchronous>, transform_indices = @transform_8, window_bounds = array<i64: 1, 256>}, {pipeline_mode = #tpu.pipeline_mode<synchronous>, transform_indices = @transform_9, window_bounds = array<i64: 128, 128>}, {pipeline_mode = #tpu.pipeline_mode<synchronous>, transform_indices = @transform_10, window_bounds = array<i64: 1, 128>}, {pipeline_mode = #tpu.pipeline_mode<synchronous>, transform_indices = @transform_11, window_bounds = array<i64: 128, 128>}, {pipeline_mode = #tpu.pipeline_mode<synchronous>, transform_indices = @transform_12, window_bounds = array<i64: 1, 128>}, {pipeline_mode = #tpu.pipeline_mode<synchronous>, transform_indices = @transform_13, window_bounds = array<i64: 128, 128>}, {pipeline_mode = #tpu.pipeline_mode<synchronous>, transform_indices = @transform_14, window_bounds = array<i64: 1, 128>}, {transform_indices = @transform_15, window_bounds = array<i64: 8, 128>}]} {
    %c0 = arith.constant 0 : index
    %c0_0 = arith.constant 0 : index
    %0 = vector.load %arg1[%c0, %c0_0] : memref<8x2xf32, #tpu.memory_space<vmem>>, vector<8x2xf32>
    %c0_1 = arith.constant 0 : index
    %c0_2 = arith.constant 0 : index
    %1 = vector.load %arg2[%c0_1, %c0_2] : memref<2x128xf32, #tpu.memory_space<vmem>>, vector<2x128xf32>
    %2 = vector.extract_strided_slice %0 {offsets = [0, 0], sizes = [8, 1], strides = [1, 1]} : vector<8x2xf32> to vector<8x1xf32>
    %3 = vector.extract_strided_slice %1 {offsets = [0, 0], sizes = [1, 128], strides = [1, 1]} : vector<2x128xf32> to vector<1x128xf32>
    %4 = vector.broadcast %2 : vector<8x1xf32> to vector<8x128xf32>
    %5 = vector.broadcast %3 : vector<1x128xf32> to vector<8x128xf32>
    %6 = arith.mulf %4, %5 : vector<8x128xf32>
    %7 = vector.extract_strided_slice %0 {offsets = [0, 1], sizes = [8, 1], strides = [1, 1]} : vector<8x2xf32> to vector<8x1xf32>
    %8 = vector.extract_strided_slice %1 {offsets = [1, 0], sizes = [1, 128], strides = [1, 1]} : vector<2x128xf32> to vector<1x128xf32>
    %9 = vector.broadcast %7 : vector<8x1xf32> to vector<8x128xf32>
    %10 = vector.broadcast %8 : vector<1x128xf32> to vector<8x128xf32>
    %11 = arith.mulf %9, %10 : vector<8x128xf32>
    %12 = arith.addf %6, %11 : vector<8x128xf32>
    %c0_3 = arith.constant 0 : index
    %c0_4 = arith.constant 0 : index
    %13 = vector.load %arg3[%c0_3, %c0_4] : memref<1x128xf32, #tpu.memory_space<vmem>>, vector<1x128xf32>
    %14 = vector.broadcast %13 : vector<1x128xf32> to vector<8x128xf32>
    %15 = arith.addf %12, %14 : vector<8x128xf32>
    %cst = arith.constant 0.000000e+00 : f32
    %16 = vector.broadcast %cst : f32 to vector<8x128xf32>
    %17 = arith.maximumf %15, %16 : vector<8x128xf32>
    %18 = arith.truncf %17 : vector<8x128xf32> to vector<8x128xbf16>
    %c0_5 = arith.constant 0 : index
    %c0_6 = arith.constant 0 : index
    %19 = vector.load %arg4[%c0_5, %c0_6] : memref<128x128xbf16, #tpu.memory_space<vmem>>, vector<128x128xbf16>
    %cst_7 = arith.constant dense<0.000000e+00> : vector<8x128xf32>
    %20 = tpu.matmul %18, %19, %cst_7 {dimension_numbers = #tpu.dot_dimension_numbers<[1], [0], [0], [1], [0, 0, 1, 1], [], []>} : vector<8x128xbf16>, vector<128x128xbf16>, vector<8x128xf32> -> vector<8x128xf32>
    %c0_8 = arith.constant 0 : index
    %c0_9 = arith.constant 0 : index
    %21 = vector.load %arg5[%c0_8, %c0_9] : memref<1x128xf32, #tpu.memory_space<vmem>>, vector<1x128xf32>
    %22 = vector.broadcast %21 : vector<1x128xf32> to vector<8x128xf32>
    %23 = arith.addf %20, %22 : vector<8x128xf32>
    %cst_10 = arith.constant 0.000000e+00 : f32
    %24 = vector.broadcast %cst_10 : f32 to vector<8x128xf32>
    %25 = arith.maximumf %23, %24 : vector<8x128xf32>
    %26 = arith.truncf %25 : vector<8x128xf32> to vector<8x128xbf16>
    %c0_11 = arith.constant 0 : index
    %c0_12 = arith.constant 0 : index
    %27 = vector.load %arg6[%c0_11, %c0_12] : memref<128x128xbf16, #tpu.memory_space<vmem>>, vector<128x128xbf16>
    %cst_13 = arith.constant dense<0.000000e+00> : vector<8x128xf32>
    %28 = tpu.matmul %26, %27, %cst_13 {dimension_numbers = #tpu.dot_dimension_numbers<[1], [0], [0], [1], [0, 0, 1, 1], [], []>} : vector<8x128xbf16>, vector<128x128xbf16>, vector<8x128xf32> -> vector<8x128xf32>
    %c0_14 = arith.constant 0 : index
    %c0_15 = arith.constant 0 : index
    %29 = vector.load %arg7[%c0_14, %c0_15] : memref<1x128xf32, #tpu.memory_space<vmem>>, vector<1x128xf32>
    %30 = vector.broadcast %29 : vector<1x128xf32> to vector<8x128xf32>
    %31 = arith.addf %28, %30 : vector<8x128xf32>
    %cst_16 = arith.constant 0.000000e+00 : f32
    %32 = vector.broadcast %cst_16 : f32 to vector<8x128xf32>
    %33 = arith.maximumf %31, %32 : vector<8x128xf32>
    %34 = arith.truncf %33 : vector<8x128xf32> to vector<8x128xbf16>
    %c0_17 = arith.constant 0 : index
    %c0_18 = arith.constant 0 : index
    %35 = vector.load %arg8[%c0_17, %c0_18] : memref<128x256xbf16, #tpu.memory_space<vmem>>, vector<128x256xbf16>
    %cst_19 = arith.constant dense<0.000000e+00> : vector<8x256xf32>
    %36 = tpu.matmul %34, %35, %cst_19 {dimension_numbers = #tpu.dot_dimension_numbers<[1], [0], [0], [1], [0, 0, 1, 1], [], []>} : vector<8x128xbf16>, vector<128x256xbf16>, vector<8x256xf32> -> vector<8x256xf32>
    %c0_20 = arith.constant 0 : index
    %c0_21 = arith.constant 0 : index
    %37 = vector.load %arg9[%c0_20, %c0_21] : memref<1x256xf32, #tpu.memory_space<vmem>>, vector<1x256xf32>
    %38 = vector.broadcast %37 : vector<1x256xf32> to vector<8x256xf32>
    %39 = arith.addf %36, %38 : vector<8x256xf32>
    %40 = vector.extract_strided_slice %39 {offsets = [0, 0], sizes = [8, 128], strides = [1, 1]} : vector<8x256xf32> to vector<8x128xf32>
    %41 = vector.extract_strided_slice %39 {offsets = [0, 128], sizes = [8, 128], strides = [1, 1]} : vector<8x256xf32> to vector<8x128xf32>
    %cst_22 = arith.constant 0.000000e+00 : f32
    %42 = vector.broadcast %cst_22 : f32 to vector<8x128xf32>
    %43 = arith.maximumf %41, %42 : vector<8x128xf32>
    %44 = arith.truncf %43 : vector<8x128xf32> to vector<8x128xbf16>
    %c0_23 = arith.constant 0 : index
    %c0_24 = arith.constant 0 : index
    %45 = vector.load %arg10[%c0_23, %c0_24] : memref<128x128xbf16, #tpu.memory_space<vmem>>, vector<128x128xbf16>
    %cst_25 = arith.constant dense<0.000000e+00> : vector<8x128xf32>
    %46 = tpu.matmul %44, %45, %cst_25 {dimension_numbers = #tpu.dot_dimension_numbers<[1], [0], [0], [1], [0, 0, 1, 1], [], []>} : vector<8x128xbf16>, vector<128x128xbf16>, vector<8x128xf32> -> vector<8x128xf32>
    %c0_26 = arith.constant 0 : index
    %c0_27 = arith.constant 0 : index
    %47 = vector.load %arg11[%c0_26, %c0_27] : memref<1x128xf32, #tpu.memory_space<vmem>>, vector<1x128xf32>
    %48 = vector.broadcast %47 : vector<1x128xf32> to vector<8x128xf32>
    %49 = arith.addf %46, %48 : vector<8x128xf32>
    %cst_28 = arith.constant 0.000000e+00 : f32
    %50 = vector.broadcast %cst_28 : f32 to vector<8x128xf32>
    %51 = arith.maximumf %49, %50 : vector<8x128xf32>
    %52 = arith.truncf %51 : vector<8x128xf32> to vector<8x128xbf16>
    %c0_29 = arith.constant 0 : index
    %c0_30 = arith.constant 0 : index
    %53 = vector.load %arg12[%c0_29, %c0_30] : memref<128x128xbf16, #tpu.memory_space<vmem>>, vector<128x128xbf16>
    %cst_31 = arith.constant dense<0.000000e+00> : vector<8x128xf32>
    %54 = tpu.matmul %52, %53, %cst_31 {dimension_numbers = #tpu.dot_dimension_numbers<[1], [0], [0], [1], [0, 0, 1, 1], [], []>} : vector<8x128xbf16>, vector<128x128xbf16>, vector<8x128xf32> -> vector<8x128xf32>
    %c0_32 = arith.constant 0 : index
    %c0_33 = arith.constant 0 : index
    %55 = vector.load %arg13[%c0_32, %c0_33] : memref<1x128xf32, #tpu.memory_space<vmem>>, vector<1x128xf32>
    %56 = vector.broadcast %55 : vector<1x128xf32> to vector<8x128xf32>
    %57 = arith.addf %54, %56 : vector<8x128xf32>
    %cst_34 = arith.constant 0.000000e+00 : f32
    %58 = vector.broadcast %cst_34 : f32 to vector<8x128xf32>
    %59 = arith.maximumf %57, %58 : vector<8x128xf32>
    %60 = arith.truncf %59 : vector<8x128xf32> to vector<8x128xbf16>
    %c0_35 = arith.constant 0 : index
    %c0_36 = arith.constant 0 : index
    %61 = vector.load %arg14[%c0_35, %c0_36] : memref<128x128xbf16, #tpu.memory_space<vmem>>, vector<128x128xbf16>
    %cst_37 = arith.constant dense<0.000000e+00> : vector<8x128xf32>
    %62 = tpu.matmul %60, %61, %cst_37 {dimension_numbers = #tpu.dot_dimension_numbers<[1], [0], [0], [1], [0, 0, 1, 1], [], []>} : vector<8x128xbf16>, vector<128x128xbf16>, vector<8x128xf32> -> vector<8x128xf32>
    %c0_38 = arith.constant 0 : index
    %c0_39 = arith.constant 0 : index
    %63 = vector.load %arg15[%c0_38, %c0_39] : memref<1x128xf32, #tpu.memory_space<vmem>>, vector<1x128xf32>
    %64 = vector.broadcast %63 : vector<1x128xf32> to vector<8x128xf32>
    %65 = arith.addf %62, %64 : vector<8x128xf32>
    %66 = tpu.iota {dimensions = array<i32: 1>} : vector<8x128xi32>
    %c8_i32 = arith.constant 8 : i32
    %67 = vector.broadcast %c8_i32 : i32 to vector<8x128xi32>
    %68 = arith.cmpi slt, %66, %67 : vector<8x128xi32>
    %69 = arith.select %68, %40, %65 : vector<8x128xi1>, vector<8x128xf32>
    %70 = arith.truncf %69 : vector<8x128xf32> to vector<8x128xbf16>
    %c0_40 = arith.constant 0 : index
    %c0_41 = arith.constant 0 : index
    %71 = vector.load %arg16[%c0_40, %c0_41] : memref<8x128xbf16, #tpu.memory_space<vmem>>, vector<8x128xbf16>
    tpu.vector_store %arg16[%c0_40, %c0_41], %70 {strides = array<i32>} : memref<8x128xbf16, #tpu.memory_space<vmem>>, vector<8x128xbf16>,
    return
  }
  func.func @transform_0(%arg0: i32) -> (i32, i32) {
    %c0_i32 = arith.constant 0 : i32
    %c0_i32_0 = arith.constant 0 : i32
    return %arg0, %c0_i32 : i32, i32
  }
  func.func @transform_1(%arg0: i32) -> (i32, i32) {
    %c0_i32 = arith.constant 0 : i32
    %c0_i32_0 = arith.constant 0 : i32
    %c0_i32_1 = arith.constant 0 : i32
    return %c0_i32, %c0_i32_0 : i32, i32
  }
  func.func @transform_2(%arg0: i32) -> (i32, i32) {
    %c0_i32 = arith.constant 0 : i32
    %c0_i32_0 = arith.constant 0 : i32
    %c0_i32_1 = arith.constant 0 : i32
    return %c0_i32, %c0_i32_0 : i32, i32
  }
  func.func @transform_3(%arg0: i32) -> (i32, i32) {
    %c0_i32 = arith.constant 0 : i32
    %c0_i32_0 = arith.constant 0 : i32
    %c0_i32_1 = arith.constant 0 : i32
    return %c0_i32, %c0_i32_0 : i32, i32
  }
  func.func @transform_4(%arg0: i32) -> (i32, i32) {
    %c0_i32 = arith.constant 0 : i32
    %c0_i32_0 = arith.constant 0 : i32
    %c0_i32_1 = arith.constant 0 : i32
    return %c0_i32, %c0_i32_0 : i32, i32
  }
  func.func @transform_5(%arg0: i32) -> (i32, i32) {
    %c0_i32 = arith.constant 0 : i32
    %c0_i32_0 = arith.constant 0 : i32
    %c0_i32_1 = arith.constant 0 : i32
    return %c0_i32, %c0_i32_0 : i32, i32
  }
  func.func @transform_6(%arg0: i32) -> (i32, i32) {
    %c0_i32 = arith.constant 0 : i32
    %c0_i32_0 = arith.constant 0 : i32
    %c0_i32_1 = arith.constant 0 : i32
    return %c0_i32, %c0_i32_0 : i32, i32
  }
  func.func @transform_7(%arg0: i32) -> (i32, i32) {
    %c0_i32 = arith.constant 0 : i32
    %c0_i32_0 = arith.constant 0 : i32
    %c0_i32_1 = arith.constant 0 : i32
    return %c0_i32, %c0_i32_0 : i32, i32
  }
  func.func @transform_8(%arg0: i32) -> (i32, i32) {
    %c0_i32 = arith.constant 0 : i32
    %c0_i32_0 = arith.constant 0 : i32
    %c0_i32_1 = arith.constant 0 : i32
    return %c0_i32, %c0_i32_0 : i32, i32
  }
  func.func @transform_9(%arg0: i32) -> (i32, i32) {
    %c0_i32 = arith.constant 0 : i32
    %c0_i32_0 = arith.constant 0 : i32
    %c0_i32_1 = arith.constant 0 : i32
    return %c0_i32, %c0_i32_0 : i32, i32
  }
  func.func @transform_10(%arg0: i32) -> (i32, i32) {
    %c0_i32 = arith.constant 0 : i32
    %c0_i32_0 = arith.constant 0 : i32
    %c0_i32_1 = arith.constant 0 : i32
    return %c0_i32, %c0_i32_0 : i32, i32
  }
  func.func @transform_11(%arg0: i32) -> (i32, i32) {
    %c0_i32 = arith.constant 0 : i32
    %c0_i32_0 = arith.constant 0 : i32
    %c0_i32_1 = arith.constant 0 : i32
    return %c0_i32, %c0_i32_0 : i32, i32
  }
  func.func @transform_12(%arg0: i32) -> (i32, i32) {
    %c0_i32 = arith.constant 0 : i32
    %c0_i32_0 = arith.constant 0 : i32
    %c0_i32_1 = arith.constant 0 : i32
    return %c0_i32, %c0_i32_0 : i32, i32
  }
  func.func @transform_13(%arg0: i32) -> (i32, i32) {
    %c0_i32 = arith.constant 0 : i32
    %c0_i32_0 = arith.constant 0 : i32
    %c0_i32_1 = arith.constant 0 : i32
    return %c0_i32, %c0_i32_0 : i32, i32
  }
  func.func @transform_14(%arg0: i32) -> (i32, i32) {
    %c0_i32 = arith.constant 0 : i32
    %c0_i32_0 = arith.constant 0 : i32
    %c0_i32_1 = arith.constant 0 : i32
    return %c0_i32, %c0_i32_0 : i32, i32
  }
  func.func @transform_15(%arg0: i32) -> (i32, i32) {
    %c0_i32 = arith.constant 0 : i32
    %c0_i32_0 = arith.constant 0 : i32
    return %arg0, %c0_i32 : i32, i32
  }
}

</mosaic_0001>

<bundles_post_ra>
// kernel: tpu_custom_call.1
= control target key start
LH: loop header
LB: loop body
LE: loop exit
PB: predicated region body
PF: predicated region fallthrough
CT: control target
= control target key end

     0   :  { %20 = vsyncpa [#allocation3], 0  ;;  %s1566_s0 = inlined_call_operand.vmem [shape: f32[8,2], index: 0, kind: input, shape index: {}]   ;;  %s1567_s1 = inlined_call_operand.vmem [shape: f32[2,128], index: 1, kind: input, shape index: {}]   ;;  %s1568_s2 = inlined_call_operand.vmem [shape: f32[1,128], index: 2, kind: input, shape index: {}]   ;;  %s1569_s3 = inlined_call_operand.hbm [shape: bf16[128,128], index: 3, kind: input, shape index: {}]   ;;  %s1570_s4 = inlined_call_operand.vmem [shape: f32[1,128], index: 4, kind: input, shape index: {}]   ;;  %s1571_s5 = inlined_call_operand.hbm [shape: bf16[128,128], index: 5, kind: input, shape index: {}]   ;;  %s1572_s6 = inlined_call_operand.vmem [shape: f32[1,128], index: 6, kind: input, shape index: {}]   ;;  %s1573_s7 = inlined_call_operand.hbm [shape: bf16[128,256], index: 7, kind: input, shape index: {}]   ;;  %s1574_s8 = inlined_call_operand.vmem [shape: f32[1,256], index: 8, kind: input, shape index: {}]   ;;  %s1575_s9 = inlined_call_operand.hbm [shape: bf16[128,128], index: 9, kind: input, shape index: {}]   ;;  %s1576_s10 = inlined_call_operand.vmem [shape: f32[1,128], index: 10, kind: input, shape index: {}]   ;;  %s1577_s11 = inlined_call_operand.hbm [shape: bf16[128,128], index: 11, kind: input, shape index: {}]   ;;  %s1578_s12 = inlined_call_operand.vmem [shape: f32[1,128], index: 12, kind: input, shape index: {}]   ;;  %s1579_s13 = inlined_call_operand.hbm [shape: bf16[128,128], index: 13, kind: input, shape index: {}]   ;;  %s1580_s14 = inlined_call_operand.vmem [shape: f32[1,128], index: 14, kind: input, shape index: {}]   ;;  %s1581_s15 = inlined_call_operand.hbm [shape: bf16[8,128], index: 15, kind: output, shape index: {}]  }
   0x1   :  { %21 = vsyncpa [#allocation6], 0 }
   0x2   :  { %22 = vsyncpa [#allocation9], 0 }
   0x3   :  { %23 = vsyncpa [#allocation12], 0 }
   0x4   :  { %24 = vsyncpa [#allocation4], 0  ;;  %s1342_s18 = smov [#allocation5]   ;;  %s1343_s20 = smov [#allocation8]  }
   0x5   :  { %s50_s19 = sshll.u32 %s1342_s18, 4  ;;  %s78_s21 = sshll.u32 %s1343_s20, 4  ;;  %s51_s19 = int_to_ptr.vmem [resolvable:$true] %s50_s19  ;;  %s79_s21 = int_to_ptr.vmem [resolvable:$true] %s78_s21 }
   0x6   :  { %s1200_s22 = scalar_lea.vmem %s51_s19, 1024  ;;  %p1205_p1 = scmp.lt.s32.totalorder %s51_s19, %s51_s19 }
   0x7   :  { %p1201_p0 = scmp.ne.s32.totalorder %s51_s19, %s1200_s22  ;;  %p1206_p2 = scmp.lt.s32.totalorder %s1200_s22, %s1200_s22 }
   0x9   :  { %p1207_p3 = por %p1206_p2, %p1205_p1 }
   0xb   :  { %p1208_p4 = pnand %p1207_p3, %p1201_p0 }
   0xd   :  { %1211 = shalt.err (!%p1208_p4)
}
   0xe   :  { %s1344_s23 = smov 64   ;;  %s1345_s24 = smov 4  }
   0xf   :  { %56 = dma.hbm_to_vmem [thread:$0]  %s1571_s5, 1024, %s51_s19, [#allocation6], %s1344_s23, %s1344_s23, %s1345_s24  }
  0x10   :  { %s1220_s27 = scalar_lea.vmem %s79_s21, 1024  ;;  %p1225_p6 = scmp.lt.s32.totalorder %s79_s21, %s79_s21 }
  0x11   :  { %p1221_p5 = scmp.ne.s32.totalorder %s79_s21, %s1220_s27  ;;  %p1226_p7 = scmp.lt.s32.totalorder %s1220_s27, %s1220_s27 }
  0x13   :  { %p1227_p8 = por %p1226_p7, %p1225_p6 }
  0x15   :  { %p1228_p9 = pnand %p1227_p8, %p1221_p5 }
  0x17   :  { %1231 = shalt.err (!%p1228_p9)
}
  0x18   :  { %84 = dma.hbm_to_vmem [thread:$0]  %s1575_s9, 1024, %s79_s21, [#allocation9], %s1344_s23, %s1344_s23, %s1345_s24  }
  0x19   :  { %s1346_s30 = smov [#allocation2]   ;;  %s1347_s17 = smov [#allocation7]  }
  0x1a   :  { %s36_s16 = sshll.u32 %s1346_s30, 4  ;;  %s64_s18 = sshll.u32 %s1347_s17, 4  ;;  %s37_s16 = int_to_ptr.vmem [resolvable:$true] %s36_s16  ;;  %s65_s18 = int_to_ptr.vmem [resolvable:$true] %s64_s18 }
  0x1b   :  { %s1240_s5 = scalar_lea.vmem %s37_s16, 1024  ;;  %p1245_p11 = scmp.lt.s32.totalorder %s37_s16, %s37_s16 }
  0x1c   :  { %p1241_p10 = scmp.ne.s32.totalorder %s37_s16, %s1240_s5  ;;  %p1246_p12 = scmp.lt.s32.totalorder %s1240_s5, %s1240_s5 }
  0x1e   :  { %p1247_p13 = por %p1246_p12, %p1245_p11 }
  0x20   :  { %p1248_p0 = pnand %p1247_p13, %p1241_p10 }
  0x22   :  { %1251 = shalt.err (!%p1248_p0)
}
  0x23   :  { %42 = dma.hbm_to_vmem [thread:$0]  %s1569_s3, 1024, %s37_s16, [#allocation3], %s1344_s23, %s1344_s23, %s1345_s24  }
  0x24   :  { %s1260_s9 = scalar_lea.vmem %s65_s18, 2048  ;;  %p1265_p2 = scmp.lt.s32.totalorder %s65_s18, %s65_s18 }
  0x25   :  { %p1261_p1 = scmp.ne.s32.totalorder %s65_s18, %s1260_s9  ;;  %p1266_p3 = scmp.lt.s32.totalorder %s1260_s9, %s1260_s9 }
  0x27   :  { %p1267_p4 = por %p1266_p3, %p1265_p2 }
  0x29   :  { %p1268_p5 = pnand %p1267_p4, %p1261_p1 }
  0x2b   :  { %1271 = shalt.err (!%p1268_p5)
}
  0x2c   :  { %s1348_s21 = smov 128   ;;  %s1349_s22 = smov 8  }
  0x2d   :  { %70 = dma.hbm_to_vmem [thread:$0]  %s1573_s7, 2048, %s65_s18, [#allocation6], %s1348_s21, %s1348_s21, %s1349_s22  }
  0x2e   :  { %s1350_s27 = smov [#allocation10]   ;;  %s1351_s29 = smov [#allocation11]  }
  0x2f   :  { %s92_s28 = sshll.u32 %s1350_s27, 4  ;;  %s106_s30 = sshll.u32 %s1351_s29, 4  ;;  %s93_s28 = int_to_ptr.vmem [resolvable:$true] %s92_s28  ;;  %s107_s30 = int_to_ptr.vmem [resolvable:$true] %s106_s30 }
  0x30   :  { %s1280_s3 = scalar_lea.vmem %s93_s28, 1024  ;;  %p1285_p7 = scmp.lt.s32.totalorder %s93_s28, %s93_s28 }
  0x31   :  { %p1281_p6 = scmp.ne.s32.totalorder %s93_s28, %s1280_s3  ;;  %p1286_p8 = scmp.lt.s32.totalorder %s1280_s3, %s1280_s3 }
  0x33   :  { %p1287_p9 = por %p1286_p8, %p1285_p7 }
  0x35   :  { %p1288_p10 = pnand %p1287_p9, %p1281_p6 }
  0x37   :  { %1291 = shalt.err (!%p1288_p10)
}
  0x38   :  { %98 = dma.hbm_to_vmem [thread:$0]  %s1577_s11, 1024, %s93_s28, [#allocation9], %s1344_s23, %s1344_s23, %s1345_s24  }
  0x39   :  { %s1300_s7 = scalar_lea.vmem %s107_s30, 1024  ;;  %p1305_p12 = scmp.lt.s32.totalorder %s107_s30, %s107_s30 }
  0x3a   :  { %p1301_p11 = scmp.ne.s32.totalorder %s107_s30, %s1300_s7  ;;  %p1306_p13 = scmp.lt.s32.totalorder %s1300_s7, %s1300_s7 }
  0x3c   :  { %p1307_p0 = por %p1306_p13, %p1305_p12 }
  0x3e   :  { %p1308_p1 = pnand %p1307_p0, %p1301_p11 }
  0x40   :  { %1311 = shalt.err (!%p1308_p1)
}
  0x41   :  { %112 = dma.hbm_to_vmem [thread:$0]  %s1579_s13, 1024, %s107_s30, [#allocation12], %s1344_s23, %s1344_s23, %s1345_s24  }
  0x42   :  { %1332 = dma.done.wait [#allocation3], 1024  }
  0x43   :  { %1333 = vsyncadd [#allocation3], 4294966272 }
  0x44   :  { %1334 = dma.done.wait [#allocation6], 3072  }
  0x45   :  { %1335 = vsyncadd [#allocation6], 4294964224 }
  0x46   :  { %1336 = dma.done.wait [#allocation9], 2048  }
  0x47   :  { %1337 = vsyncadd [#allocation9], 4294965248 }
  0x48   :  { %1338 = dma.done.wait [#allocation12], 1024  }
  0x49   :  { %1339 = vsyncadd [#allocation12], 4294966272  ;;  %v1352_v0 = vmov 0   ;;  %v1353_v1 = vmov 0.0   ;;  %v134_v2 = vld [vmem:[%s1566_s0] sm:$0xff]  ;;  %v1128_v3 = vld [vmem:[#allocation2 + $0x38] sm:$0xff]   ;;  %v141_v18 = vlaneseq }
  0x4a   :  { %1126 = vset.pattern.permute.xlu0 %v1352_v0  ;;  %1011 = vmatprep.subr.bf16.mxu0 %v1353_v1  ;;  %v1129_v4 = vld [vmem:[#allocation2 + $0x30] sm:$0xff]   ;;  %v1354_v5 = vmov 1   ;;  %v1130_v6 = vld [vmem:[#allocation2 + $0x28] sm:$0xff]   ;;  %vm1355_vm0 = vmmov 0   ;;  %v1131_v7 = vld [vmem:[#allocation2 + $0x20] sm:$0xff]  }
  0x4b   :  { %1031 = vmatprep.subr.bf16.mxu1 %v1353_v1  ;;  %138 = vperm.xlu0 %1126, %v134_v2   ;;  %v1136_v8 = vld [vmem:[#allocation5 + $0x38] sm:$0xff]   ;;  %v1137_v9 = vld [vmem:[#allocation5 + $0x30] sm:$0xff]   ;;  %v1138_v11 = vld [vmem:[#allocation5 + $0x28] sm:$0xff]   ;;  %v1494_v19 = vshrl.u32 %v141_v18, 7 }
  0x4c   :  { %1012 = vmatpush3.bf16.msra.mxu0 %v1128_v3  ;;  %1027 = vmatprep.mubr.msk.bf16.mxu0 %vm1355_vm0, %v1353_v1  ;;  %v1132_v10 = vld [vmem:[#allocation2 + $0x18] sm:$0xff]   ;;  %v1133_v12 = vld [vmem:[#allocation2 + $0x10] sm:$0xff]   ;;  %v1139_v13 = vld [vmem:[#allocation5 + $0x20] sm:$0xff]  }
  0x4d   :  { %1013 = vmatprep.subr.bf16.mxu0 %v1353_v1  ;;  %1047 = vmatprep.mubr.msk.bf16.mxu1 %vm1355_vm0, %v1353_v1  ;;  %v1134_v14 = vld [vmem:[#allocation2 + $0x8] sm:$0xff]   ;;  %v1140_v15 = vld [vmem:[#allocation5 + $0x18] sm:$0xff]   ;;  %v1135_v16 = vld [vmem:[#allocation2] sm:$0xff]   ;;  %v143_v20 = vsub.s32 0, %v1494_v19  ;;  %v152_v21 = vsub.s32 1, %v1494_v19 }
  0x4e   :  { %1032 = vmatpush3.bf16.msra.mxu1 %v1136_v8  ;;  %v1141_v17 = vld [vmem:[#allocation5 + $0x10] sm:$0xff]   ;;  %v135_v22 = vld [vmem:[%s1567_s1] sm:$0x3]  ;;  %v1142_v34 = vld [vmem:[#allocation5 + $0x8] sm:$0xff]  }
  0x4f   :  { %1127 = vset.pattern.permute.xlu0 %v1354_v5  ;;  %1033 = vmatprep.subr.bf16.mxu1 %v1353_v1  ;;  %v144_v24 = vrot.slane %v135_v22, %v143_v20  ;;  %v153_v25 = vrot.slane %v135_v22, %v152_v21  ;;  %v904_v29 = vld [vmem:[%s1568_s2] ss:$0 sm:$0xff]  ;;  %v1144_v36 = vld [vmem:[#allocation7 + $0x70] ss:$8 sps:$4 sm:$0xff]   ;;  %v1146_v37 = vld [vmem:[#allocation7 + $0x74] ss:$8 sps:$4 sm:$0xff]  }
  0x50   :  { %147 = vperm.xlu0 %1127, %v134_v2   ;;  %1014 = vmatpush3.bf16.msra.mxu0 %v1129_v4  ;;  %v1143_v35 = vld [vmem:[#allocation5] sm:$0xff]   ;;  %v1152_v40 = vld [vmem:[#allocation7 + $0x54] ss:$8 sps:$4 sm:$0xff]   ;;  %v1150_v41 = vld [vmem:[#allocation7 + $0x50] ss:$8 sps:$4 sm:$0xff]  }
  0x51   :  { %1015 = vmatprep.subr.bf16.mxu0 %v1353_v1  ;;  %v1149_v38 = vld [vmem:[#allocation7 + $0x64] ss:$8 sps:$4 sm:$0xff]   ;;  %v1147_v39 = vld [vmem:[#allocation7 + $0x60] ss:$8 sps:$4 sm:$0xff]   ;;  %v1158_v44 = vld [vmem:[#allocation7 + $0x34] ss:$8 sps:$4 sm:$0xff]  }
  0x52   :  { %1034 = vmatpush3.bf16.msra.mxu1 %v1137_v9  ;;  %v1155_v42 = vld [vmem:[#allocation7 + $0x44] ss:$8 sps:$4 sm:$0xff]   ;;  %v1153_v43 = vld [vmem:[#allocation7 + $0x40] ss:$8 sps:$4 sm:$0xff]   ;;  %v1156_v45 = vld [vmem:[#allocation7 + $0x30] ss:$8 sps:$4 sm:$0xff]  }
  0x53   :  { %1035 = vmatprep.subr.bf16.mxu1 %v1353_v1  ;;  %v1161_v46 = vld [vmem:[#allocation7 + $0x24] ss:$8 sps:$4 sm:$0xff]   ;;  %v1159_v47 = vld [vmem:[#allocation7 + $0x20] ss:$8 sps:$4 sm:$0xff]   ;;  %v1164_v48 = vld [vmem:[#allocation7 + $0x14] ss:$8 sps:$4 sm:$0xff]  }
  0x54   :  { %1016 = vmatpush3.bf16.msra.mxu0 %v1130_v6  ;;  %v1162_v49 = vld [vmem:[#allocation7 + $0x10] ss:$8 sps:$4 sm:$0xff]   ;;  %v905_v50 = vld [vmem:[%s1570_s4] ss:$0 sm:$0xff]  ;;  %v1167_v58 = vld [vmem:[#allocation7 + $0x4] ss:$8 sps:$4 sm:$0xff]  }
  0x55   :  { %1017 = vmatprep.subr.bf16.mxu0 %v1353_v1  ;;  %v1165_v59 = vld [vmem:[#allocation7] ss:$8 sps:$4 sm:$0xff]   ;;  %v1168_v60 = vld [vmem:[#allocation8 + $0x38] sm:$0xff]   ;;  %v1169_v61 = vld [vmem:[#allocation8 + $0x30] sm:$0xff]  }
  0x56   :  { %1036 = vmatpush3.bf16.msra.mxu1 %v1138_v11  ;;  %v1170_v62 = vld [vmem:[#allocation8 + $0x28] sm:$0xff]   ;;  %v1171_v63 = vld [vmem:[#allocation8 + $0x20] sm:$0xff]   ;;  %v1173_v2 = vld [vmem:[#allocation8 + $0x10] sm:$0xff]  }
  0x57   :  { %1037 = vmatprep.subr.bf16.mxu1 %v1353_v1  ;;  %v914_v3 = vld [vmem:[%s1572_s6] ss:$0 sm:$0xff]  ;;  %v1174_v11 = vld [vmem:[#allocation8 + $0x8] sm:$0xff]   ;;  %v1181_v22 = vld [vmem:[#allocation10 + $0x10] sm:$0xff]  }
  0x58   :  { %1018 = vmatpush3.bf16.msra.mxu0 %v1131_v7 }
  0x59   :  { %1019 = vmatprep.subr.bf16.mxu0 %v1353_v1 }
  0x5a   :  { %1038 = vmatpush3.bf16.msra.mxu1 %v1139_v13  ;;  %v1176_v13 = vld [vmem:[#allocation10 + $0x38] sm:$0xff]  }
  0x5b   :  { %1039 = vmatprep.subr.bf16.mxu1 %v1353_v1 }
  0x5c   :  { %1020 = vmatpush3.bf16.msra.mxu0 %v1132_v10 }
  0x5d   :  { %1021 = vmatprep.subr.bf16.mxu0 %v1353_v1 }
  0x5e   :  { %1040 = vmatpush3.bf16.msra.mxu1 %v1140_v15  ;;  %v1178_v15 = vld [vmem:[#allocation10 + $0x28] sm:$0xff]  }
  0x5f   :  { %1041 = vmatprep.subr.bf16.mxu1 %v1353_v1 }
  0x60   :  { %1022 = vmatpush3.bf16.msra.mxu0 %v1133_v12  ;;  %v1175_v12 = vld [vmem:[#allocation8] sm:$0xff]  }
  0x61   :  { %1023 = vmatprep.subr.bf16.mxu0 %v1353_v1 }
  0x62   :  { %1042 = vmatpush3.bf16.msra.mxu1 %v1141_v17  ;;  %v1180_v17 = vld [vmem:[#allocation10 + $0x18] sm:$0xff]  }
  0x63   :  { %1043 = vmatprep.subr.bf16.mxu1 %v1353_v1 }
  0x64   :  { %1024 = vmatpush3.bf16.msra.mxu0 %v1134_v14  ;;  %v1177_v14 = vld [vmem:[#allocation10 + $0x30] sm:$0xff]  }
  0x65   :  { %1025 = vmatprep.subr.bf16.mxu0 %v1353_v1 }
  0x66   :  { %1044 = vmatpush3.bf16.msra.mxu1 %v1142_v34  ;;  %v1184_v34 = vld [vmem:[#allocation11 + $0x38] sm:$0xff]  }
  0x67   :  { %1045 = vmatprep.subr.bf16.mxu1 %v1353_v1 }
  0x68   :  { %1026 = vmatpush3.bf16.msra.mxu0 %v1135_v16  ;;  %v1179_v16 = vld [vmem:[#allocation10 + $0x20] sm:$0xff]  }
  0x69   :  { %500 = vmatprep.subr.bf16.mxu0 %v1146_v37  ;;  %v1188_v37 = vld [vmem:[#allocation11 + $0x18] sm:$0xff]  }
  0x6a   :  { %1046 = vmatpush3.bf16.msra.mxu1 %v1143_v35  ;;  %v1186_v35 = vld [vmem:[#allocation11 + $0x28] sm:$0xff]  }
  0x6b   :  { %1051 = vmatprep.subr.bf16.mxu1 %v1353_v1 }
  0xc6   :  { %v139_v23 = vpop.permute.xlu0 %138 }
  0xc7   :  { %v145_v27 = vmul.f32 %v144_v24, %v139_v23  ;;  %v408_v23 = vld [vmem:[%s1574_s8] sm:$0x3] }
  0xc8   :  { %v417_v24 = vrot.slane %v408_v23, %v152_v21  ;;  %v1185_v21 = vld [vmem:[#allocation11 + $0x30] sm:$0xff]  }
  0xcb   :  { %v148_v26 = vpop.permute.xlu0 %147 }
  0xcc   :  { %v154_v28 = vmul.f32 %v153_v25, %v148_v26 }
  0xce   :  { %v155_v30 = vadd.f32 %v154_v28, %v145_v27 }
  0xd0   :  { %v163_v31 = vadd.f32 %v904_v29, %v155_v30 }
  0xd2   :  { %v164_v32 = vmax.f32 %v163_v31, 0.0 }
  0xd4   :  { %v165_v33 = vpack.c.bf16 %v164_v32, %v164_v32  ;;  %v1182_v32 = vld [vmem:[#allocation10 + $0x8] sm:$0xff]  }
  0xd6   :  { %1028 = vmatmul.mubr.bf16.vlgmr.msra.gmra.mxu0 %v165_v33  ;;  %v1183_v33 = vld [vmem:[#allocation10] sm:$0xff]  }
  0xd7   :  { %532 = vmatprep.mubr.bf16.mxu0 %v1352_v0  ;;  %501 = vmatpush1.bf16.msra.mxu0 %v1144_v36  ;;  %v1172_v0 = vld [vmem:[#allocation8 + $0x18] sm:$0xff]   ;;  %v1187_v36 = vld [vmem:[#allocation11 + $0x20] sm:$0xff]  }
  0xd8   :  { %502 = vmatprep.subr.bf16.mxu0 %v1149_v38  ;;  %v1189_v38 = vld [vmem:[#allocation11 + $0x10] sm:$0xff]  }
  0xdb   :  { %503 = vmatpush1.bf16.msra.mxu0 %v1147_v39  ;;  %v939_v39 = vld [vmem:[%s1576_s10] ss:$0 sm:$0xff] }
  0xdc   :  { %504 = vmatprep.subr.bf16.mxu0 %v1152_v40 }
  0xdf   :  { %505 = vmatpush1.bf16.msra.mxu0 %v1150_v41 }
  0xe0   :  { %506 = vmatprep.subr.bf16.mxu0 %v1155_v42 }
  0xe3   :  { %507 = vmatpush1.bf16.msra.mxu0 %v1153_v43 }
  0xe4   :  { %508 = vmatprep.subr.bf16.mxu0 %v1158_v44 }
  0xe7   :  { %509 = vmatpush1.bf16.msra.mxu0 %v1156_v45 }
  0xe8   :  { %510 = vmatprep.subr.bf16.mxu0 %v1161_v46 }
  0xeb   :  { %511 = vmatpush1.bf16.msra.mxu0 %v1159_v47  ;;  %v1190_v47 = vld [vmem:[#allocation11 + $0x8] sm:$0xff]  }
  0xec   :  { %512 = vmatprep.subr.bf16.mxu0 %v1164_v48  ;;  %v1191_v48 = vld [vmem:[#allocation11] sm:$0xff]  }
  0xef   :  { %513 = vmatpush1.bf16.msra.mxu0 %v1162_v49  ;;  %v948_v49 = vld [vmem:[%s1578_s12] ss:$0 sm:$0xff]  ;;  %s1356_s12 = smov [#allocation13]  }
  0xf0   :  { %514 = vmatprep.subr.bf16.mxu0 %v1167_v58  ;;  %v413_v58 = vrot.slane %v408_v23, %v143_v20  ;;  %s892_s27 = sshll.u32 %s1356_s12, 4  ;;  %s893_s27 = int_to_ptr.vmem [resolvable:$true] %s892_s27 }
  0xf1   :  { %s1312_s28 = scalar_lea.vmem %s893_s27, 64  ;;  %p1317_p3 = scmp.lt.s32.totalorder %s893_s27, %s893_s27 }
  0xf2   :  { %p1313_p2 = scmp.ne.s32.totalorder %s893_s27, %s1312_s28  ;;  %p1318_p4 = scmp.lt.s32.totalorder %s1312_s28, %s1312_s28 }
  0xf3   :  { %515 = vmatpush1.bf16.msra.mxu0 %v1165_v59 }
  0xf4   :  { %1071 = vmatprep.subr.bf16.mxu0 %v1353_v1  ;;  %p1319_p5 = por %p1318_p4, %p1317_p3 }
  0xf6   :  { %p1320_p6 = pnand %p1319_p5, %p1313_p2 }
 0x196   :  { %v271_v51 = vpop.f32.mrf.mxu0 }
 0x197   :  { %v272_v52 = vadd.f32 %v905_v50, %v271_v51 }
 0x198   :  { %v1029_v53 = vpop.f32.mrf.mxu0 }
 0x199   :  { %v277_v54 = vmax.f32 %v272_v52, 0.0 }
 0x19a   :  { %v274_v55 = vpop.f32.mrf.mxu0 }
 0x19b   :  { %v278_v56 = vpack.c.bf16 %v277_v54, %v277_v54 }
 0x19c   :  { %v1030_v57 = vpop.f32.mrf.mxu0 }
 0x19d   :  { %1048 = vmatmul.mubr.bf16.vlgmr.msra.gmra.mxu1 %v278_v56  ;;  %v881_v57 = vand.u32 127, %v141_v18 }
 0x19e   :  { %1067 = vmatprep.mubr.msk.bf16.mxu1 %vm1355_vm0, %v1353_v1  ;;  %1052 = vmatpush3.bf16.msra.mxu1 %v1168_v60 }
 0x19f   :  { %1053 = vmatprep.subr.bf16.mxu1 %v1353_v1  ;;  %vm882_vm1 = vcmp.lt.s32.totalorder %v881_v57, 8 }
 0x1a2   :  { %1054 = vmatpush3.bf16.msra.mxu1 %v1169_v61 }
 0x1a3   :  { %1055 = vmatprep.subr.bf16.mxu1 %v1353_v1 }
 0x1a6   :  { %1056 = vmatpush3.bf16.msra.mxu1 %v1170_v62 }
 0x1a7   :  { %1057 = vmatprep.subr.bf16.mxu1 %v1353_v1 }
 0x1aa   :  { %1058 = vmatpush3.bf16.msra.mxu1 %v1171_v63 }
 0x1ab   :  { %1059 = vmatprep.subr.bf16.mxu1 %v1353_v1 }
 0x1ae   :  { %1060 = vmatpush3.bf16.msra.mxu1 %v1172_v0 }
 0x1af   :  { %1061 = vmatprep.subr.bf16.mxu1 %v1353_v1 }
 0x1b2   :  { %1062 = vmatpush3.bf16.msra.mxu1 %v1173_v2 }
 0x1b3   :  { %1063 = vmatprep.subr.bf16.mxu1 %v1353_v1 }
 0x1b6   :  { %1064 = vmatpush3.bf16.msra.mxu1 %v1174_v11 }
 0x1b7   :  { %1065 = vmatprep.subr.bf16.mxu1 %v1353_v1 }
 0x1ba   :  { %1066 = vmatpush3.bf16.msra.mxu1 %v1175_v12 }
 0x1bb   :  { %1091 = vmatprep.subr.bf16.mxu1 %v1353_v1 }
 0x25d   :  { %v384_v4 = vpop.f32.mrf.mxu1 }
 0x25e   :  { %v385_v5 = vadd.f32 %v914_v3, %v384_v4 }
 0x25f   :  { %v1049_v6 = vpop.f32.mrf.mxu1 }
 0x260   :  { %v390_v7 = vmax.f32 %v385_v5, 0.0 }
 0x261   :  { %v387_v8 = vpop.f32.mrf.mxu1 }
 0x262   :  { %v391_v9 = vpack.c.bf16 %v390_v7, %v390_v7 }
 0x263   :  { %v1050_v10 = vpop.f32.mrf.mxu1 }
 0x264   :  { %533 = vmatmul.mubr.bf16.vlgmr.msra.gmra.mxu0 %v391_v9 }
 0x265   :  { %1087 = vmatprep.mubr.msk.bf16.mxu0 %vm1355_vm0, %v1353_v1  ;;  %1072 = vmatpush3.bf16.msra.mxu0 %v1176_v13 }
 0x266   :  { %1073 = vmatprep.subr.bf16.mxu0 %v1353_v1 }
 0x269   :  { %1074 = vmatpush3.bf16.msra.mxu0 %v1177_v14 }
 0x26a   :  { %1075 = vmatprep.subr.bf16.mxu0 %v1353_v1 }
 0x26d   :  { %1076 = vmatpush3.bf16.msra.mxu0 %v1178_v15 }
 0x26e   :  { %1077 = vmatprep.subr.bf16.mxu0 %v1353_v1 }
 0x271   :  { %1078 = vmatpush3.bf16.msra.mxu0 %v1179_v16 }
 0x272   :  { %1079 = vmatprep.subr.bf16.mxu0 %v1353_v1 }
 0x275   :  { %1080 = vmatpush3.bf16.msra.mxu0 %v1180_v17 }
 0x276   :  { %1081 = vmatprep.subr.bf16.mxu0 %v1353_v1 }
 0x279   :  { %1082 = vmatpush3.bf16.msra.mxu0 %v1181_v22 }
 0x27a   :  { %1083 = vmatprep.subr.bf16.mxu0 %v1353_v1 }
 0x27d   :  { %1084 = vmatpush3.bf16.msra.mxu0 %v1182_v32 }
 0x27e   :  { %1085 = vmatprep.subr.bf16.mxu0 %v1353_v1 }
 0x281   :  { %1086 = vmatpush3.bf16.msra.mxu0 %v1183_v33 }
 0x324   :  { %v534_v25 = vpop.f32.mrf.mxu0 }
 0x325   :  { %v535_v60 = vadd.f32 %v534_v25, %v413_v58 }
 0x326   :  { %v536_v26 = vpop.f32.mrf.mxu0 }
 0x327   :  { %v537_v27 = vadd.f32 %v536_v26, %v417_v24 }
 0x328   :  { %v538_v28 = vpop.f32.mrf.mxu0 }
 0x329   :  { %v541_v29 = vmax.f32 %v537_v27, 0.0 }
 0x32a   :  { %v539_v30 = vpop.f32.mrf.mxu0 }
 0x32b   :  { %v542_v31 = vpack.c.bf16 %v541_v29, %v541_v29 }
 0x32d   :  { %1068 = vmatmul.mubr.bf16.vlgmr.msra.gmra.mxu1 %v542_v31 }
 0x32e   :  { %1107 = vmatprep.mubr.msk.bf16.mxu1 %vm1355_vm0, %v1353_v1  ;;  %1092 = vmatpush3.bf16.msra.mxu1 %v1184_v34 }
 0x32f   :  { %1093 = vmatprep.subr.bf16.mxu1 %v1353_v1 }
 0x332   :  { %1094 = vmatpush3.bf16.msra.mxu1 %v1185_v21 }
 0x333   :  { %1095 = vmatprep.subr.bf16.mxu1 %v1353_v1 }
 0x336   :  { %1096 = vmatpush3.bf16.msra.mxu1 %v1186_v35 }
 0x337   :  { %1097 = vmatprep.subr.bf16.mxu1 %v1353_v1 }
 0x33a   :  { %1098 = vmatpush3.bf16.msra.mxu1 %v1187_v36 }
 0x33b   :  { %1099 = vmatprep.subr.bf16.mxu1 %v1353_v1 }
 0x33e   :  { %1100 = vmatpush3.bf16.msra.mxu1 %v1188_v37 }
 0x33f   :  { %1101 = vmatprep.subr.bf16.mxu1 %v1353_v1 }
 0x342   :  { %1102 = vmatpush3.bf16.msra.mxu1 %v1189_v38 }
 0x343   :  { %1103 = vmatprep.subr.bf16.mxu1 %v1353_v1 }
 0x346   :  { %1104 = vmatpush3.bf16.msra.mxu1 %v1190_v47 }
 0x347   :  { %1105 = vmatprep.subr.bf16.mxu1 %v1353_v1  ;;  %v957_v1 = vld [vmem:[%s1580_s14] ss:$0 sm:$0xff] }
 0x34a   :  { %1106 = vmatpush3.bf16.msra.mxu1 %v1191_v48 }
 0x3ed   :  { %v648_v40 = vpop.f32.mrf.mxu1 }
 0x3ee   :  { %v649_v41 = vadd.f32 %v939_v39, %v648_v40 }
 0x3ef   :  { %v1069_v42 = vpop.f32.mrf.mxu1 }
 0x3f0   :  { %v654_v43 = vmax.f32 %v649_v41, 0.0 }
 0x3f1   :  { %v651_v44 = vpop.f32.mrf.mxu1 }
 0x3f2   :  { %v655_v45 = vpack.c.bf16 %v654_v43, %v654_v43 }
 0x3f3   :  { %v1070_v46 = vpop.f32.mrf.mxu1 }
 0x3f4   :  { %1088 = vmatmul.mubr.bf16.vlgmr.msra.gmra.mxu0 %v655_v45 }
 0x4b4   :  { %v761_v50 = vpop.f32.mrf.mxu0 }
 0x4b5   :  { %v762_v51 = vadd.f32 %v948_v49, %v761_v50 }
 0x4b6   :  { %v1089_v52 = vpop.f32.mrf.mxu0 }
 0x4b7   :  { %v767_v53 = vmax.f32 %v762_v51, 0.0 }
 0x4b8   :  { %v764_v54 = vpop.f32.mrf.mxu0 }
 0x4b9   :  { %v768_v55 = vpack.c.bf16 %v767_v53, %v767_v53 }
 0x4ba   :  { %v1090_v56 = vpop.f32.mrf.mxu0 }
 0x4bb   :  { %1108 = vmatmul.mubr.bf16.vlgmr.msra.gmra.mxu1 %v768_v55 }
 0x57b   :  { %v874_v59 = vpop.f32.mrf.mxu1 }
 0x57c   :  { %v875_v61 = vadd.f32 %v957_v1, %v874_v59 }
 0x57d   :  { %v1109_v62 = vpop.f32.mrf.mxu1 }
 0x57e   :  { %v883_v63 = vsel %vm882_vm1, %v535_v60, %v875_v61 }
 0x57f   :  { %v877_v0 = vpop.f32.mrf.mxu1  ;;  %v884_v2 = vpack.c.bf16 %v883_v63, %v883_v63 }
 0x581   :  { %v1110_v3 = vpop.f32.mrf.mxu1  ;;  %885 = vst [vmem:[#allocation13] sm:$0xf] %v884_v2 }
 0x582   :  { %1323 = shalt.err (!%p1320_p6)
}
 0x583   :  { %895 = dma.vmem_to_hbm [thread:$0]  %s893_s27, 64, %s1581_s15, [#allocation4]  }
 0x584   :  { %1340 = dma.done.wait [#allocation4], 64  }
 0x585   :  { %1341 = vsyncadd [#allocation4], 4294967232 }
 0x586   :  { %899 = vsyncpa [#allocation3], 1 }
 0x587   :  { %900 = vsyncpa [#allocation6], 1 }
 0x588   :  { %901 = vsyncpa [#allocation9], 1 }
 0x589   :  { %902 = vsyncpa [#allocation12], 1 }
 0x58a   :  { %903 = vsyncpa [#allocation4], 1 }

</bundles_post_ra>
